<compile_context>
chip_gen: v7x
topology: tpu7x:2x2x1
jax: 0.10.0
libtpu: 0.0.40
codegen_flags: <defaults>
</compile_context>

<pallas_src>
import functools

import jax
import jax.numpy as jnp
from jax.experimental import pallas as pl
from jax.experimental.pallas import tpu as pltpu


def _round_up(n, m):
    return ((n + m - 1) // m) * m


def _critic_kernel(x_ref, w_ref, b_ref, o_ref, *, in_dim, lane, o2, o3, compute_dtype):
    # x_ref: (TB, in_dim) bf16   w_ref: (o3+lane, lane) bf16   b_ref: (24, lane) f32
    x = x_ref[...]
    w1 = w_ref[0:in_dim, :]          # (in_dim, lane)  cols >= mid are zero
    w2 = w_ref[o2:o2 + lane, :]      # (lane, lane)    rows/cols >= mid are zero
    w3 = w_ref[o3:o3 + lane, :]      # (lane, lane)    rows >= mid / cols >= out are zero
    b1 = b_ref[0:1, :]               # (1, lane) f32
    b2 = b_ref[8:9, :]
    b3 = b_ref[16:17, :]

    h1 = jnp.dot(x, w1, preferred_element_type=jnp.float32) + b1
    a1 = jnp.maximum(h1, 0.0).astype(compute_dtype)
    h2 = jnp.dot(a1, w2, preferred_element_type=jnp.float32) + b2
    a2 = jnp.maximum(h2, 0.0).astype(compute_dtype)
    out = jnp.dot(a2, w3, preferred_element_type=jnp.float32) + b3
    o_ref[...] = out.astype(o_ref.dtype)


def pack_params(w1, b1, w2, b2, w3, b3, compute_dtype=jnp.bfloat16):
    """Pack (in,out)-layout weights into one lane-padded bf16 slab + one f32 bias slab."""
    in_dim, mid = w1.shape
    out_dim = w3.shape[1]
    lane = max(_round_up(mid, 128), _round_up(out_dim, 128))
    o2 = _round_up(in_dim, 8)        # row offset of w2 (sublane aligned)
    o3 = o2 + lane                   # row offset of w3
    rows = o3 + lane

    wpack = jnp.zeros((rows, lane), compute_dtype)
    wpack = wpack.at[0:in_dim, 0:mid].set(w1.astype(compute_dtype))
    wpack = wpack.at[o2:o2 + mid, 0:mid].set(w2.astype(compute_dtype))
    wpack = wpack.at[o3:o3 + mid, 0:out_dim].set(w3.astype(compute_dtype))

    bpack = jnp.zeros((24, lane), jnp.float32)
    bpack = bpack.at[0, 0:mid].set(b1.reshape(-1).astype(jnp.float32))
    bpack = bpack.at[8, 0:mid].set(b2.reshape(-1).astype(jnp.float32))
    bpack = bpack.at[16, 0:out_dim].set(b3.reshape(-1).astype(jnp.float32))

    meta = dict(in_dim=in_dim, lane=lane, o2=o2, o3=o3, out_dim=out_dim)
    return wpack, bpack, meta


@functools.partial(
    jax.jit, static_argnames=("in_dim", "lane", "o2", "o3", "out_dim", "tb"))
def critic_forward(x, wpack, bpack, *, in_dim, lane, o2, o3, out_dim, tb=512):
    B = x.shape[0]
    compute_dtype = wpack.dtype
    xc = x.astype(compute_dtype)

    # Batch tile: multiple of 8, capped at 512 rows (>=512-row tiles ~ HBM roofline;
    # tiles are tiny vs. 32 MiB scoped VMEM even double-buffered, so no vmem override).
    tb = min(tb, _round_up(B, 8))
    b_pad = _round_up(B, tb)
    if b_pad != B:
        xc = jnp.pad(xc, ((0, b_pad - B), (0, 0)))

    kernel = functools.partial(
        _critic_kernel,
        in_dim=in_dim, lane=lane, o2=o2, o3=o3, compute_dtype=compute_dtype)

    out = pl.pallas_call(
        kernel,
        out_shape=jax.ShapeDtypeStruct((b_pad, lane), jnp.float32),
        grid=(pl.cdiv(b_pad, tb),),
        in_specs=[
            pl.BlockSpec((tb, in_dim), lambda i: (i, 0)),    # batch-tiled activations
            pl.BlockSpec(wpack.shape, lambda i: (0, 0)),     # VMEM-resident weights
            pl.BlockSpec(bpack.shape, lambda i: (0, 0)),     # VMEM-resident biases
        ],
        out_specs=pl.BlockSpec((tb, lane), lambda i: (i, 0)),
        compiler_params=pltpu.CompilerParams(
            dimension_semantics=("parallel",)),              # megacore over batch
    )(xc, wpack, bpack)

    return out[:B, :out_dim]


def init_linear(key, in_dim, out_dim):
    # PyTorch nn.Linear default init: U(-1/sqrt(in_dim), 1/sqrt(in_dim)).
    kw, kb = jax.random.split(key)
    bound = 1.0 / float(in_dim) ** 0.5
    # Stored as (in_dim, out_dim) == transpose of PyTorch's (out, in).
    w = jax.random.uniform(kw, (in_dim, out_dim), jnp.float32, -bound, bound)
    b = jax.random.uniform(kb, (1, out_dim), jnp.float32, -bound, bound)
    return w, b


if __name__ == "__main__":
    # Critic(inDim=32, midDim=64, outDim=4), batch=8.
    B, IN_DIM, MID_DIM, OUT_DIM = 8, 32, 64, 4

    key = jax.random.PRNGKey(0)
    kx, k1, k2, k3 = jax.random.split(key, 4)

    x = jax.random.normal(kx, (B, IN_DIM), jnp.float32)
    w1, b1 = init_linear(k1, IN_DIM, MID_DIM)
    w2, b2 = init_linear(k2, MID_DIM, MID_DIM)
    w3, b3 = init_linear(k3, MID_DIM, OUT_DIM)

    wpack, bpack, meta = pack_params(w1, b1, w2, b2, w3, b3)  # pack once, reuse per step
    out = critic_forward(x, wpack, bpack, **meta)
    out = jax.block_until_ready(out)
    assert out.shape == (B, OUT_DIM)

    # Reference (a): same bf16-input / f32-accumulate recipe as the kernel (tight tol).
    xb = x.astype(jnp.bfloat16)
    w1b, w2b, w3b = (w.astype(jnp.bfloat16) for w in (w1, w2, w3))
    r1 = jnp.maximum(jnp.dot(xb, w1b, preferred_element_type=jnp.float32) + b1, 0.0)
    r2 = jnp.maximum(jnp.dot(r1.astype(jnp.bfloat16), w2b,
                             preferred_element_type=jnp.float32) + b2, 0.0)
    ref_bf16 = jnp.dot(r2.astype(jnp.bfloat16), w3b,
                       preferred_element_type=jnp.float32) + b3

    # Reference (b): original f32 module semantics (loose tol for bf16 rounding).
    a1 = jnp.maximum(x @ w1 + b1, 0.0)
    a2 = jnp.maximum(a1 @ w2 + b2, 0.0)
    ref_f32 = a2 @ w3 + b3

    assert jnp.allclose(out, ref_bf16, atol=1e-2, rtol=1e-2), "mismatch vs bf16 reference"
    assert jnp.allclose(out, ref_f32, atol=5e-2, rtol=5e-2), "mismatch vs f32 reference"
    print("KERNEL_OK")
</pallas_src>

<mosaic_0001>
module attributes {stable_mosaic.version = 11 : i64} {
  func.func @_critic_kernel(%arg0: i32, %arg1: memref<8x32xbf16, #tpu.memory_space<vmem>>, %arg2: memref<288x128xbf16, #tpu.memory_space<vmem>>, %arg3: memref<24x128xf32, #tpu.memory_space<vmem>>, %arg4: memref<8x128xf32, #tpu.memory_space<vmem>>) attributes {dimension_semantics = [#tpu.dimension_semantics<parallel>], iteration_bounds = array<i64: 1>, scalar_prefetch = 0 : i64, scratch_operands = 0 : i64, tpu.core_type = #tpu.core_type<tc>, window_params = [{transform_indices = @transform_0, window_bounds = array<i64: 8, 32>}, {pipeline_mode = #tpu.pipeline_mode<synchronous>, transform_indices = @transform_1, window_bounds = array<i64: 288, 128>}, {pipeline_mode = #tpu.pipeline_mode<synchronous>, transform_indices = @transform_2, window_bounds = array<i64: 24, 128>}, {transform_indices = @transform_3, window_bounds = array<i64: 8, 128>}]} {
    %c0 = arith.constant 0 : index
    %c0_0 = arith.constant 0 : index
    %0 = vector.load %arg1[%c0, %c0_0] : memref<8x32xbf16, #tpu.memory_space<vmem>>, vector<8x32xbf16>
    %c0_1 = arith.constant 0 : index
    %c0_2 = arith.constant 0 : index
    %1 = vector.load %arg2[%c0_1, %c0_2] : memref<288x128xbf16, #tpu.memory_space<vmem>>, vector<32x128xbf16>
    %c32 = arith.constant 32 : index
    %c0_3 = arith.constant 0 : index
    %2 = vector.load %arg2[%c32, %c0_3] : memref<288x128xbf16, #tpu.memory_space<vmem>>, vector<128x128xbf16>
    %c160 = arith.constant 160 : index
    %c0_4 = arith.constant 0 : index
    %3 = vector.load %arg2[%c160, %c0_4] : memref<288x128xbf16, #tpu.memory_space<vmem>>, vector<128x128xbf16>
    %c0_5 = arith.constant 0 : index
    %c0_6 = arith.constant 0 : index
    %4 = vector.load %arg3[%c0_5, %c0_6] : memref<24x128xf32, #tpu.memory_space<vmem>>, vector<1x128xf32>
    %c8 = arith.constant 8 : index
    %c0_7 = arith.constant 0 : index
    %5 = vector.load %arg3[%c8, %c0_7] : memref<24x128xf32, #tpu.memory_space<vmem>>, vector<1x128xf32>
    %c16 = arith.constant 16 : index
    %c0_8 = arith.constant 0 : index
    %6 = vector.load %arg3[%c16, %c0_8] : memref<24x128xf32, #tpu.memory_space<vmem>>, vector<1x128xf32>
    %cst = arith.constant dense<0.000000e+00> : vector<8x128xf32>
    %7 = tpu.matmul %0, %1, %cst {dimension_numbers = #tpu.dot_dimension_numbers<[1], [0], [0], [1], [0, 0, 1, 1], [], []>} : vector<8x32xbf16>, vector<32x128xbf16>, vector<8x128xf32> -> vector<8x128xf32>
    %8 = vector.broadcast %4 : vector<1x128xf32> to vector<8x128xf32>
    %9 = arith.addf %7, %8 : vector<8x128xf32>
    %cst_9 = arith.constant 0.000000e+00 : f32
    %10 = vector.broadcast %cst_9 : f32 to vector<8x128xf32>
    %11 = arith.maximumf %9, %10 : vector<8x128xf32>
    %12 = arith.truncf %11 : vector<8x128xf32> to vector<8x128xbf16>
    %cst_10 = arith.constant dense<0.000000e+00> : vector<8x128xf32>
    %13 = tpu.matmul %12, %2, %cst_10 {dimension_numbers = #tpu.dot_dimension_numbers<[1], [0], [0], [1], [0, 0, 1, 1], [], []>} : vector<8x128xbf16>, vector<128x128xbf16>, vector<8x128xf32> -> vector<8x128xf32>
    %14 = vector.broadcast %5 : vector<1x128xf32> to vector<8x128xf32>
    %15 = arith.addf %13, %14 : vector<8x128xf32>
    %cst_11 = arith.constant 0.000000e+00 : f32
    %16 = vector.broadcast %cst_11 : f32 to vector<8x128xf32>
    %17 = arith.maximumf %15, %16 : vector<8x128xf32>
    %18 = arith.truncf %17 : vector<8x128xf32> to vector<8x128xbf16>
    %cst_12 = arith.constant dense<0.000000e+00> : vector<8x128xf32>
    %19 = tpu.matmul %18, %3, %cst_12 {dimension_numbers = #tpu.dot_dimension_numbers<[1], [0], [0], [1], [0, 0, 1, 1], [], []>} : vector<8x128xbf16>, vector<128x128xbf16>, vector<8x128xf32> -> vector<8x128xf32>
    %20 = vector.broadcast %6 : vector<1x128xf32> to vector<8x128xf32>
    %21 = arith.addf %19, %20 : vector<8x128xf32>
    %c0_13 = arith.constant 0 : index
    %c0_14 = arith.constant 0 : index
    %22 = vector.load %arg4[%c0_13, %c0_14] : memref<8x128xf32, #tpu.memory_space<vmem>>, vector<8x128xf32>
    tpu.vector_store %arg4[%c0_13, %c0_14], %21 {strides = array<i32>} : memref<8x128xf32, #tpu.memory_space<vmem>>, vector<8x128xf32>,
    return
  }
  func.func @transform_0(%arg0: i32) -> (i32, i32) {
    %c0_i32 = arith.constant 0 : i32
    %c0_i32_0 = arith.constant 0 : i32
    return %arg0, %c0_i32 : i32, i32
  }
  func.func @transform_1(%arg0: i32) -> (i32, i32) {
    %c0_i32 = arith.constant 0 : i32
    %c0_i32_0 = arith.constant 0 : i32
    %c0_i32_1 = arith.constant 0 : i32
    return %c0_i32, %c0_i32_0 : i32, i32
  }
  func.func @transform_2(%arg0: i32) -> (i32, i32) {
    %c0_i32 = arith.constant 0 : i32
    %c0_i32_0 = arith.constant 0 : i32
    %c0_i32_1 = arith.constant 0 : i32
    return %c0_i32, %c0_i32_0 : i32, i32
  }
  func.func @transform_3(%arg0: i32) -> (i32, i32) {
    %c0_i32 = arith.constant 0 : i32
    %c0_i32_0 = arith.constant 0 : i32
    return %arg0, %c0_i32 : i32, i32
  }
}

</mosaic_0001>

<bundles_post_ra>
// kernel: critic_forward.1
= control target key start
LH: loop header
LB: loop body
LE: loop exit
PB: predicated region body
PF: predicated region fallthrough
CT: control target
= control target key end

     0   :  { %8 = vsyncpa [#allocation3], 0  ;;  %s585_s0 = inlined_call_operand.vmem [shape: bf16[8,32], index: 0, kind: input, shape index: {}]   ;;  %s586_s1 = inlined_call_operand.hbm [shape: bf16[288,128], index: 1, kind: input, shape index: {}]   ;;  %s587_s2 = inlined_call_operand.hbm [shape: f32[24,128], index: 2, kind: input, shape index: {}]   ;;  %s588_s3 = inlined_call_operand.vmem [shape: f32[8,128], index: 3, kind: output, shape index: {}]  }
   0x1   :  { %9 = vsyncpa [#allocation5], 0  ;;  %s503_s12 = smov [#allocation2]   ;;  %s455_s16 = scalar_lea.hbm %s586_s1, 2304 }
   0x2   :  { %s17_s13 = sshll.u32 %s503_s12, 4  ;;  %p456_p0 = scmp.ne.s32.totalorder %s586_s1, %s455_s16  ;;  %s18_s13 = int_to_ptr.vmem [resolvable:$true] %s17_s13 }
   0x3   :  { %p459_p1 = scmp.lt.u32.totalorder %s455_s16, %s586_s1 }
   0x5   :  { %p461_p2 = pnand %p459_p1, %p456_p0 }
   0x7   :  { %464 = shalt.err (!%p461_p2)
}
   0x8   :  { %s465_s21 = scalar_lea.vmem %s18_s13, 2304  ;;  %p470_p4 = scmp.lt.s32.totalorder %s18_s13, %s18_s13 }
   0x9   :  { %p466_p3 = scmp.ne.s32.totalorder %s18_s13, %s465_s21  ;;  %p471_p5 = scmp.lt.s32.totalorder %s465_s21, %s465_s21 }
   0xb   :  { %p472_p6 = por %p471_p5, %p470_p4 }
   0xd   :  { %p473_p7 = pnand %p472_p6, %p466_p3 }
   0xf   :  { %476 = shalt.err (!%p473_p7)
}
  0x10   :  { %s504_s22 = smov 64   ;;  %s505_s23 = smov 4  }
  0x11   :  { %23 = dma.hbm_to_vmem [thread:$0]  %s586_s1, 2304, %s18_s13, [#allocation3], %s504_s22, %s504_s22, %s505_s23  }
  0x12   :  { %s506_s26 = smov [#allocation4]   ;;  %s477_s30 = scalar_lea.hbm %s587_s2, 384 }
  0x13   :  { %s29_s27 = sshll.u32 %s506_s26, 4  ;;  %p478_p8 = scmp.ne.s32.totalorder %s587_s2, %s477_s30  ;;  %s30_s27 = int_to_ptr.vmem [resolvable:$true] %s29_s27 }
  0x14   :  { %p481_p9 = scmp.lt.u32.totalorder %s477_s30, %s587_s2 }
  0x16   :  { %p483_p10 = pnand %p481_p9, %p478_p8 }
  0x18   :  { %486 = shalt.err (!%p483_p10)
}
  0x19   :  { %s487_s8 = scalar_lea.vmem %s30_s27, 384  ;;  %p492_p12 = scmp.lt.s32.totalorder %s30_s27, %s30_s27 }
  0x1a   :  { %p488_p11 = scmp.ne.s32.totalorder %s30_s27, %s487_s8  ;;  %p493_p13 = scmp.lt.s32.totalorder %s487_s8, %s487_s8 }
  0x1c   :  { %p494_p0 = por %p493_p13, %p492_p12 }
  0x1e   :  { %p495_p1 = pnand %p494_p0, %p488_p11 }
  0x20   :  { %498 = shalt.err (!%p495_p1)
}
  0x21   :  { %s507_s1 = smov 128   ;;  %s508_s9 = smov 8  }
  0x22   :  { %35 = dma.hbm_to_vmem [thread:$0]  %s587_s2, 384, %s30_s27, [#allocation5], %s507_s1, %s507_s1, %s508_s9  }
  0x23   :  { %499 = dma.done.wait [#allocation3], 2304  }
  0x24   :  { %500 = vsyncadd [#allocation3], 4294964992 }
  0x25   :  { %501 = dma.done.wait [#allocation5], 384  }
  0x26   :  { %502 = vsyncadd [#allocation5], 4294966912  ;;  %v509_v0 = vmov 0.0   ;;  %vm510_vm0 = vmmov 0   ;;  %v437_v1 = vld [vmem:[#allocation2] sm:$0xff]   ;;  %v438_v2 = vld [vmem:[#allocation2 + $0x8] sm:$0xff]  }
  0x27   :  { %381 = vmatprep.subr.bf16.mxu0 %v509_v0  ;;  %385 = vmatprep.mubr.msk.bf16.mxu0 %vm510_vm0, %v509_v0  ;;  %v439_v3 = vld [vmem:[#allocation2 + $0x10] sm:$0xff]   ;;  %vm99_vm1 = vcmask 261120   ;;  %v440_v4 = vld [vmem:[#allocation2 + $0x18] sm:$0xff]   ;;  %v43_v5 = vld [vmem:[%s585_s0] sm:$0xf] }
  0x28   :  { %389 = vmatprep.subr.bf16.mxu1 %v509_v0  ;;  %405 = vmatprep.mubr.msk.bf16.mxu1 %vm510_vm0, %v509_v0  ;;  %v441_v6 = vld [vmem:[#allocation2 + $0x20] sm:$0xff]   ;;  %v442_v7 = vld [vmem:[#allocation2 + $0x28] sm:$0xff]   ;;  %v443_v8 = vld [vmem:[#allocation2 + $0x30] sm:$0xff]  }
  0x29   :  { %382 = vmatpush3.bf16.msra.mxu0 %v437_v1  ;;  %390 = vmatpush3.bf16.msra.mxu1 %v439_v3  ;;  %v444_v9 = vld [vmem:[#allocation2 + $0x38] sm:$0xff]   ;;  %v445_v10 = vld [vmem:[#allocation2 + $0x40] sm:$0xff]   ;;  %v446_v11 = vld [vmem:[#allocation2 + $0x48] sm:$0xff]  }
  0x2a   :  { %383 = vmatprep.subr.bf16.mxu0 %v509_v0  ;;  %391 = vmatprep.subr.bf16.mxu1 %v509_v0  ;;  %v447_v12 = vld [vmem:[#allocation2 + $0x50] sm:$0xff]   ;;  %v448_v13 = vld [vmem:[#allocation2 + $0x58] sm:$0xff]   ;;  %v449_v14 = vld [vmem:[#allocation2 + $0x60] sm:$0xff]  }
  0x2b   :  { %v450_v15 = vld [vmem:[#allocation2 + $0x68] sm:$0xff]   ;;  %v451_v16 = vld [vmem:[#allocation2 + $0x70] sm:$0xff]   ;;  %v452_v17 = vld [vmem:[#allocation2 + $0x78] sm:$0xff]  }
  0x2c   :  { %v338_v18 = vld [vmem:[#allocation4] ss:$0 sm:$0xff]  ;;  %v453_v26 = vld [vmem:[#allocation2 + $0x80] sm:$0xff]   ;;  %v454_v27 = vld [vmem:[#allocation2 + $0x88] sm:$0xff]  }
  0x2d   :  { %384 = vmatpush3.bf16.msra.mxu0 %v438_v2  ;;  %392 = vmatpush3.bf16.msra.mxu1 %v440_v4  ;;  %v342_v28 = vld [vmem:[#allocation4 + $0x8] ss:$0 sm:$0xff]  ;;  %v351_v36 = vld [vmem:[#allocation4 + $0x10] ss:$0 sm:$0xff] }
  0x2e   :  { %409 = vmatprep.subr.bf16.mxu0 %v509_v0  ;;  %393 = vmatprep.subr.bf16.mxu1 %v509_v0 }
  0x30   :  { %386 = vmatmul.mubr.msk.bf16.vlgmr.msra.gmra.mrb[0].mxu0 %vm99_vm1, %v43_v5 }
  0x31   :  { %425 = vmatprep.mubr.msk.bf16.mxu0 %vm510_vm0, %v509_v0  ;;  %394 = vmatpush3.bf16.msra.mxu1 %v441_v6 }
  0x32   :  { %395 = vmatprep.subr.bf16.mxu1 %v509_v0  ;;  %410 = vmatpush3.bf16.msra.mxu0 %v447_v12 }
  0x33   :  { %411 = vmatprep.subr.bf16.mxu0 %v509_v0 }
  0x35   :  { %396 = vmatpush3.bf16.msra.mxu1 %v442_v7 }
  0x36   :  { %397 = vmatprep.subr.bf16.mxu1 %v509_v0  ;;  %412 = vmatpush3.bf16.msra.mxu0 %v448_v13 }
  0x37   :  { %413 = vmatprep.subr.bf16.mxu0 %v509_v0 }
  0x39   :  { %398 = vmatpush3.bf16.msra.mxu1 %v443_v8 }
  0x3a   :  { %399 = vmatprep.subr.bf16.mxu1 %v509_v0  ;;  %414 = vmatpush3.bf16.msra.mxu0 %v449_v14 }
  0x3b   :  { %415 = vmatprep.subr.bf16.mxu0 %v509_v0 }
  0x3d   :  { %400 = vmatpush3.bf16.msra.mxu1 %v444_v9 }
  0x3e   :  { %401 = vmatprep.subr.bf16.mxu1 %v509_v0  ;;  %416 = vmatpush3.bf16.msra.mxu0 %v450_v15 }
  0x3f   :  { %417 = vmatprep.subr.bf16.mxu0 %v509_v0 }
  0x41   :  { %402 = vmatpush3.bf16.msra.mxu1 %v445_v10 }
  0x42   :  { %403 = vmatprep.subr.bf16.mxu1 %v509_v0  ;;  %418 = vmatpush3.bf16.msra.mxu0 %v451_v16 }
  0x43   :  { %419 = vmatprep.subr.bf16.mxu0 %v509_v0 }
  0x45   :  { %404 = vmatpush3.bf16.msra.mxu1 %v446_v11 }
  0x46   :  { %420 = vmatpush3.bf16.msra.mxu0 %v452_v17 }
  0x47   :  { %421 = vmatprep.subr.bf16.mxu0 %v509_v0 }
  0x4a   :  { %422 = vmatpush3.bf16.msra.mxu0 %v453_v26 }
  0x4b   :  { %423 = vmatprep.subr.bf16.mxu0 %v509_v0 }
  0x4e   :  { %424 = vmatpush3.bf16.msra.mxu0 %v454_v27 }
 0x103   :  { %v137_v19 = vpop.f32.mrb[0].mxu0 }
 0x104   :  { %v138_v20 = vadd.f32 %v338_v18, %v137_v19  ;;  %v387_v21 = vpop.f32.mrb[1].mxu0 }
 0x105   :  { %v140_v22 = vpop.f32.mrb[2].mxu0 }
 0x106   :  { %v143_v23 = vmax.f32 %v138_v20, 0.0  ;;  %v388_v24 = vpop.f32.mrb[3].mxu0 }
 0x108   :  { %v144_v25 = vpack.c.bf16 %v143_v23, %v143_v23 }
 0x10a   :  { %406 = vmatmul.mubr.bf16.vlgmr.msra.gmra.mrb[0].mxu1 %v144_v25 }
 0x1dd   :  { %v231_v29 = vpop.f32.mrb[0].mxu1 }
 0x1de   :  { %v232_v30 = vadd.f32 %v342_v28, %v231_v29  ;;  %v407_v31 = vpop.f32.mrb[1].mxu1 }
 0x1df   :  { %v234_v32 = vpop.f32.mrb[2].mxu1 }
 0x1e0   :  { %v237_v33 = vmax.f32 %v232_v30, 0.0  ;;  %v408_v34 = vpop.f32.mrb[3].mxu1 }
 0x1e2   :  { %v238_v35 = vpack.c.bf16 %v237_v33, %v237_v33 }
 0x1e4   :  { %426 = vmatmul.mubr.bf16.vlgmr.msra.gmra.mrb[4].mxu0 %v238_v35 }
 0x2b7   :  { %v325_v37 = vpop.f32.mrb[4].mxu0 }
 0x2b8   :  { %v326_v38 = vadd.f32 %v351_v36, %v325_v37  ;;  %v427_v39 = vpop.f32.mrb[5].mxu0 }
 0x2b9   :  { %v328_v40 = vpop.f32.mrb[6].mxu0 }
 0x2ba   :  { %331 = vst [vmem:[%s588_s3] sm:$0xff] %v326_v38  ;;  %v428_v41 = vpop.f32.mrb[7].mxu0 }
 0x2bb   :  { %336 = vsyncpa [#allocation3], 1 }
 0x2bc   :  { %337 = vsyncpa [#allocation5], 1 }

</bundles_post_ra>
